<compile_context>
chip_gen: v7x
topology: tpu7x:2x2x1
jax: 0.10.0
libtpu: 0.0.40
codegen_flags: <defaults>
</compile_context>

<pallas_src>
import jax
import jax.numpy as jnp
from jax.experimental import pallas as pl
from jax.experimental.pallas import tpu as pltpu

LEAKY_SLOPE = 0.01  # torch.nn.LeakyReLU default negative_slope
LANES = 128


def _round_up(x, m):
    return (x + m - 1) // m * m


def _make_mlp_kernel(n_linear):
    """Fused MLP: n_linear Linear layers; LeakyReLU (+ Dropout p=0 -> no-op)
    after every layer except the last (matches MLP / IQN.g)."""

    def kernel(*refs):
        x_ref, out_ref = refs[0], refs[-1]
        wb_refs = refs[1:-1]  # w1, b1, w2, b2, ...
        h = x_ref[...]
        for i in range(n_linear):
            w = wb_refs[2 * i][...]
            b = wb_refs[2 * i + 1][...]            # bias kept f32
            h = jnp.dot(h, w, preferred_element_type=jnp.float32) + b
            if i < n_linear - 1:
                # LeakyReLU in f32; Dropout(p=0.0) in eval is the identity.
                h = jnp.maximum(h, LEAKY_SLOPE * h)
                h = h.astype(w.dtype)              # back to matmul dtype
        out_ref[...] = h.astype(out_ref.dtype)

    return kernel


def _pad_params(params, pad_output):
    """Zero-pad hidden widths (and optionally the final out-dim) to multiples
    of 128 lanes.  Zero columns/rows contribute nothing, so results are exact."""
    n_linear = len(params) // 2
    padded = []
    for i in range(n_linear):
        w, b = params[2 * i], params[2 * i + 1]
        in_dim, out_dim = w.shape
        in_pad = in_dim if i == 0 else _round_up(in_dim, LANES)
        last = i == n_linear - 1
        out_pad = out_dim if (last and not pad_output) else _round_up(out_dim, LANES)
        padded.append(jnp.pad(w, ((0, in_pad - in_dim), (0, out_pad - out_dim))))
        padded.append(jnp.pad(b, ((0, 0), (0, out_pad - out_dim))))
    return padded


def iqn_forward(x, params, *, tb=4096, matmul_dtype=jnp.bfloat16, pad_output=False):
    """IQN.forward: x (B, D_in) -> (B, embedding_dim), float32.

    params = (w1, b1, w2, b2, ..., wL, bL) with wi: (in, out), bi: (1, out).
    """
    B, D = x.shape
    n_linear = len(params) // 2
    out_dim = params[-2].shape[1]

    # --- lane-pad hidden widths (and optionally the final out-dim) ------------
    params = _pad_params(params, pad_output)
    out_cols = params[-2].shape[1]

    # --- matmul operand dtype (bf16 = native MXU path on v6e/v7x) -------------
    x = x.astype(matmul_dtype)
    params = [p.astype(matmul_dtype) if p.ndim == 2 and p.shape[0] > 1 else
              p.astype(jnp.float32) for p in params]          # weights bf16, biases f32

    # --- large batch tiles; >=2 grid steps when possible (v7x megacore) -------
    half_b = _round_up(pl.cdiv(B, 2), 8)
    tb_eff = max(8, min(tb, half_b))          # tile is a multiple of 8 sublanes
    B_pad = _round_up(B, tb_eff)
    if B_pad != B:
        x = jnp.pad(x, ((0, B_pad - B), (0, 0)))
    grid = (B_pad // tb_eff,)

    in_specs = [pl.BlockSpec((tb_eff, D), lambda i: (i, 0))]      # x batch tile
    for w, b in zip(params[0::2], params[1::2]):
        in_specs.append(pl.BlockSpec(w.shape, lambda i: (0, 0)))  # full weight
        in_specs.append(pl.BlockSpec(b.shape, lambda i: (0, 0)))  # full bias

    flops = 2 * B_pad * sum(int(w.shape[0]) * int(w.shape[1]) for w in params[0::2])
    bytes_accessed = (x.size * x.dtype.itemsize
                      + sum(int(p.size) * p.dtype.itemsize for p in params)
                      + B_pad * out_cols * 4)

    out = pl.pallas_call(
        _make_mlp_kernel(n_linear),
        out_shape=jax.ShapeDtypeStruct((B_pad, out_cols), jnp.float32),
        grid_spec=pltpu.PrefetchScalarGridSpec(
            num_scalar_prefetch=0,
            grid=grid,
            in_specs=in_specs,
            out_specs=pl.BlockSpec((tb_eff, out_cols), lambda i: (i, 0)),
        ),
        compiler_params=pltpu.CompilerParams(
            dimension_semantics=("parallel",),
            vmem_limit_bytes=48 * 1024 * 1024),
        cost_estimate=pl.CostEstimate(flops=flops, transcendentals=0,
                                      bytes_accessed=bytes_accessed),
    )(x, *params)

    if B_pad != B:
        out = out[:B]
    if out_cols != out_dim:
        out = out[:, :out_dim]
    return out


def init_params(key, layer_sizes):
    """PyTorch nn.Linear-style init for the IQN.g MLP (layer_sizes includes
    both the input dim and the final embedding dim; no extra head)."""
    sizes = list(layer_sizes)
    params = []
    for i in range(len(sizes) - 1):
        fan_in, fan_out = sizes[i], sizes[i + 1]
        key, kw, kb = jax.random.split(key, 3)
        bound = 1.0 / (fan_in ** 0.5)
        w = jax.random.uniform(kw, (fan_in, fan_out), jnp.float32, -bound, bound)
        b = jax.random.uniform(kb, (1, fan_out), jnp.float32, -bound, bound)
        params += [w, b]
    return tuple(params)


def reference_forward(x, params):
    """Pure-JAX reference of IQN.forward (== MLP g) for sanity checking."""
    n_linear = len(params) // 2
    h = x
    for i in range(n_linear):
        w, b = params[2 * i], params[2 * i + 1]
        h = h @ w + b
        if i < n_linear - 1:
            h = jnp.where(h >= 0.0, h, LEAKY_SLOPE * h)
    return h


if __name__ == "__main__":
    # IQN(layer_sizes=[32, 64, 64, 64]): input dim 32, embedding_dim 64,
    # g = Linear(32,64)+LReLU -> Linear(64,64)+LReLU -> Linear(64,64).
    layer_sizes = [32, 64, 64, 64]
    batch = 200  # NOT a multiple of the tile (exercises padding + 2-step grid)

    key = jax.random.PRNGKey(0)
    key, kx = jax.random.split(key)
    x = jax.random.normal(kx, (batch, layer_sizes[0]), jnp.float32)
    params = init_params(key, layer_sizes)

    ref = reference_forward(x, params)

    # Exact f32-operand path (bit-compatible with the reference).
    out_f32 = jax.block_until_ready(iqn_forward(x, params, matmul_dtype=jnp.float32))
    assert out_f32.shape == (batch, layer_sizes[-1])
    assert jnp.allclose(out_f32, ref, atol=1e-4, rtol=1e-4), "f32 mismatch vs reference"

    # Fast bf16-operand path (native MXU on v6e/v7x); f32 accumulation, so the
    # error stays small but the 1e-4 tolerance must be relaxed.
    out_bf16 = jax.block_until_ready(iqn_forward(x, params, matmul_dtype=jnp.bfloat16))
    assert out_bf16.shape == (batch, layer_sizes[-1])
    assert jnp.allclose(out_bf16, ref, atol=5e-2, rtol=5e-2), "bf16 mismatch vs reference"

    print("KERNEL_OK")
</pallas_src>

<mosaic_0001>
module attributes {stable_mosaic.version = 11 : i64} {
  func.func @kernel(%arg0: i32, %arg1: memref<104x32xf32, #tpu.memory_space<vmem>>, %arg2: memref<32x128xf32, #tpu.memory_space<vmem>>, %arg3: memref<1x128xf32, #tpu.memory_space<vmem>>, %arg4: memref<128x128xf32, #tpu.memory_space<vmem>>, %arg5: memref<1x128xf32, #tpu.memory_space<vmem>>, %arg6: memref<128x64xf32, #tpu.memory_space<vmem>>, %arg7: memref<1x64xf32, #tpu.memory_space<vmem>>, %arg8: memref<104x64xf32, #tpu.memory_space<vmem>>) attributes {dimension_semantics = [#tpu.dimension_semantics<parallel>], iteration_bounds = array<i64: 2>, scalar_prefetch = 0 : i64, scratch_operands = 0 : i64, tpu.core_type = #tpu.core_type<tc>, window_params = [{transform_indices = @transform_0, window_bounds = array<i64: 104, 32>}, {pipeline_mode = #tpu.pipeline_mode<synchronous>, transform_indices = @transform_1, window_bounds = array<i64: 32, 128>}, {pipeline_mode = #tpu.pipeline_mode<synchronous>, transform_indices = @transform_2, window_bounds = array<i64: 1, 128>}, {pipeline_mode = #tpu.pipeline_mode<synchronous>, transform_indices = @transform_3, window_bounds = array<i64: 128, 128>}, {pipeline_mode = #tpu.pipeline_mode<synchronous>, transform_indices = @transform_4, window_bounds = array<i64: 1, 128>}, {pipeline_mode = #tpu.pipeline_mode<synchronous>, transform_indices = @transform_5, window_bounds = array<i64: 128, 64>}, {pipeline_mode = #tpu.pipeline_mode<synchronous>, transform_indices = @transform_6, window_bounds = array<i64: 1, 64>}, {transform_indices = @transform_7, window_bounds = array<i64: 104, 64>}]} {
    %c0 = arith.constant 0 : index
    %c0_0 = arith.constant 0 : index
    %0 = vector.load %arg1[%c0, %c0_0] : memref<104x32xf32, #tpu.memory_space<vmem>>, vector<104x32xf32>
    %c0_1 = arith.constant 0 : index
    %c0_2 = arith.constant 0 : index
    %1 = vector.load %arg2[%c0_1, %c0_2] : memref<32x128xf32, #tpu.memory_space<vmem>>, vector<32x128xf32>
    %c0_3 = arith.constant 0 : index
    %c0_4 = arith.constant 0 : index
    %2 = vector.load %arg3[%c0_3, %c0_4] : memref<1x128xf32, #tpu.memory_space<vmem>>, vector<1x128xf32>
    %cst = arith.constant dense<0.000000e+00> : vector<104x128xf32>
    %3 = tpu.matmul %0, %1, %cst {dimension_numbers = #tpu.dot_dimension_numbers<[1], [0], [0], [1], [0, 0, 1, 1], [], []>} : vector<104x32xf32>, vector<32x128xf32>, vector<104x128xf32> -> vector<104x128xf32>
    %4 = vector.broadcast %2 : vector<1x128xf32> to vector<104x128xf32>
    %5 = arith.addf %3, %4 : vector<104x128xf32>
    %cst_5 = arith.constant 0.00999999977 : f32
    %6 = vector.broadcast %cst_5 : f32 to vector<104x128xf32>
    %7 = arith.mulf %6, %5 : vector<104x128xf32>
    %8 = arith.maximumf %5, %7 : vector<104x128xf32>
    %c0_6 = arith.constant 0 : index
    %c0_7 = arith.constant 0 : index
    %9 = vector.load %arg4[%c0_6, %c0_7] : memref<128x128xf32, #tpu.memory_space<vmem>>, vector<128x128xf32>
    %c0_8 = arith.constant 0 : index
    %c0_9 = arith.constant 0 : index
    %10 = vector.load %arg5[%c0_8, %c0_9] : memref<1x128xf32, #tpu.memory_space<vmem>>, vector<1x128xf32>
    %cst_10 = arith.constant dense<0.000000e+00> : vector<104x128xf32>
    %11 = tpu.matmul %8, %9, %cst_10 {dimension_numbers = #tpu.dot_dimension_numbers<[1], [0], [0], [1], [0, 0, 1, 1], [], []>} : vector<104x128xf32>, vector<128x128xf32>, vector<104x128xf32> -> vector<104x128xf32>
    %12 = vector.broadcast %10 : vector<1x128xf32> to vector<104x128xf32>
    %13 = arith.addf %11, %12 : vector<104x128xf32>
    %cst_11 = arith.constant 0.00999999977 : f32
    %14 = vector.broadcast %cst_11 : f32 to vector<104x128xf32>
    %15 = arith.mulf %14, %13 : vector<104x128xf32>
    %16 = arith.maximumf %13, %15 : vector<104x128xf32>
    %c0_12 = arith.constant 0 : index
    %c0_13 = arith.constant 0 : index
    %17 = vector.load %arg6[%c0_12, %c0_13] : memref<128x64xf32, #tpu.memory_space<vmem>>, vector<128x64xf32>
    %c0_14 = arith.constant 0 : index
    %c0_15 = arith.constant 0 : index
    %18 = vector.load %arg7[%c0_14, %c0_15] : memref<1x64xf32, #tpu.memory_space<vmem>>, vector<1x64xf32>
    %cst_16 = arith.constant dense<0.000000e+00> : vector<104x64xf32>
    %19 = tpu.matmul %16, %17, %cst_16 {dimension_numbers = #tpu.dot_dimension_numbers<[1], [0], [0], [1], [0, 0, 1, 1], [], []>} : vector<104x128xf32>, vector<128x64xf32>, vector<104x64xf32> -> vector<104x64xf32>
    %20 = vector.broadcast %18 : vector<1x64xf32> to vector<104x64xf32>
    %21 = arith.addf %19, %20 : vector<104x64xf32>
    %c0_17 = arith.constant 0 : index
    %c0_18 = arith.constant 0 : index
    %22 = vector.load %arg8[%c0_17, %c0_18] : memref<104x64xf32, #tpu.memory_space<vmem>>, vector<104x64xf32>
    tpu.vector_store %arg8[%c0_17, %c0_18], %21 {strides = array<i32>} : memref<104x64xf32, #tpu.memory_space<vmem>>, vector<104x64xf32>,
    return
  }
  func.func @transform_0(%arg0: i32) -> (i32, i32) {
    %c0_i32 = arith.constant 0 : i32
    %c0_i32_0 = arith.constant 0 : i32
    return %arg0, %c0_i32 : i32, i32
  }
  func.func @transform_1(%arg0: i32) -> (i32, i32) {
    %c0_i32 = arith.constant 0 : i32
    %c0_i32_0 = arith.constant 0 : i32
    %c0_i32_1 = arith.constant 0 : i32
    return %c0_i32, %c0_i32_0 : i32, i32
  }
  func.func @transform_2(%arg0: i32) -> (i32, i32) {
    %c0_i32 = arith.constant 0 : i32
    %c0_i32_0 = arith.constant 0 : i32
    %c0_i32_1 = arith.constant 0 : i32
    return %c0_i32, %c0_i32_0 : i32, i32
  }
  func.func @transform_3(%arg0: i32) -> (i32, i32) {
    %c0_i32 = arith.constant 0 : i32
    %c0_i32_0 = arith.constant 0 : i32
    %c0_i32_1 = arith.constant 0 : i32
    return %c0_i32, %c0_i32_0 : i32, i32
  }
  func.func @transform_4(%arg0: i32) -> (i32, i32) {
    %c0_i32 = arith.constant 0 : i32
    %c0_i32_0 = arith.constant 0 : i32
    %c0_i32_1 = arith.constant 0 : i32
    return %c0_i32, %c0_i32_0 : i32, i32
  }
  func.func @transform_5(%arg0: i32) -> (i32, i32) {
    %c0_i32 = arith.constant 0 : i32
    %c0_i32_0 = arith.constant 0 : i32
    %c0_i32_1 = arith.constant 0 : i32
    return %c0_i32, %c0_i32_0 : i32, i32
  }
  func.func @transform_6(%arg0: i32) -> (i32, i32) {
    %c0_i32 = arith.constant 0 : i32
    %c0_i32_0 = arith.constant 0 : i32
    %c0_i32_1 = arith.constant 0 : i32
    return %c0_i32, %c0_i32_0 : i32, i32
  }
  func.func @transform_7(%arg0: i32) -> (i32, i32) {
    %c0_i32 = arith.constant 0 : i32
    %c0_i32_0 = arith.constant 0 : i32
    return %arg0, %c0_i32 : i32, i32
  }
}

</mosaic_0001>

<bundles_post_ra>
// kernel: tpu_custom_call.1
= control target key start
LH: loop header
LB: loop body
LE: loop exit
PB: predicated region body
PF: predicated region fallthrough
CT: control target
= control target key end

     0   :  { %s1313_s24 = smov 0   ;;  %s1638_s0 = inlined_call_operand.vmem [shape: f32[208,32], index: 0, kind: input, shape index: {}]   ;;  %s1639_s1 = inlined_call_operand.vmem [shape: f32[32,128], index: 1, kind: input, shape index: {}]   ;;  %s1640_s2 = inlined_call_operand.vmem [shape: f32[1,128], index: 2, kind: input, shape index: {}]   ;;  %s1641_s3 = inlined_call_operand.vmem [shape: f32[128,128], index: 3, kind: input, shape index: {}]   ;;  %s1642_s4 = inlined_call_operand.vmem [shape: f32[1,128], index: 4, kind: input, shape index: {}]   ;;  %s1643_s5 = inlined_call_operand.vmem [shape: f32[128,64], index: 5, kind: input, shape index: {}]   ;;  %s1644_s6 = inlined_call_operand.vmem [shape: f32[1,64], index: 6, kind: input, shape index: {}]   ;;  %s1645_s7 = inlined_call_operand.vmem [shape: f32[208,64], index: 7, kind: output, shape index: {}]  }
   0x1 LB: > { %s904_s25 = sadd.s32 4294967295, %s1268_s24   ;;  %p908_p0 = scmp.ge.s32.totalorder %s1268_s24, 1  ;;  %s1268_s24 = sphi %s1313_s24, %s17_s24  }
   0x2   : > { %p238_p1 = scmp.lt.s32.totalorder %s1268_s24, 3 }
   0x4   : > { %p239_p2 = pnand %p908_p0, %p238_p1 }
   0x5   : > { %v295_v0 = vld [vmem:[%s1639_s1] sm:$0xff] (!%p239_p2)  ;;  %v296_v1 = vld [vmem:[%s1639_s1 + $0x8] sm:$0xff] (!%p239_p2)  ;;  %v297_v2 = vld [vmem:[%s1639_s1 + $0x10] sm:$0xff] (!%p239_p2)  ;;  %v1270_v3 = vmov (!%p239_p2), 0.0|0.0   ;;  %vm1271_vm0 = vmmov (!%p239_p2), 0   ;;  %v1272_v6 = vmov (!%p239_p2), 0.0  }
   0x6   : > { %242 = sbr.rel (%p239_p2) target bundleno = 716 (0x2cc), region = 48  ;;  %1193 = vmatprep.subr.bf16.mxu0 (!%p239_p2), %v1270_v3  ;;  %v1194_v4 = vpack.c.bf16 (!%p239_p2), %v296_v1, %v295_v0  ;;  %v298_v5 = vld [vmem:[%s1639_s1 + $0x18] sm:$0xff] (!%p239_p2)  ;;  %1012 = vmatprep.mubr.msk.f32.mxu0 (!%p239_p2), %vm1271_vm0, %v1272_v6  ;;  %v502_v8 = vld [vmem:[%s1641_s3] sm:$0xff] (!%p239_p2)  ;;  %v503_v9 = vld [vmem:[%s1641_s3 + $0x8] sm:$0xff] (!%p239_p2)  ;;  %vm306_vm1 = vcmask (!%p239_p2), 261120   ;;  %vm834_vm2 = vcmask (!%p239_p2), 523264  }
   0x7   : > { %s270_s11 = smul.u32 (!%p239_p2), 13, %s904_s25  ;;  %1247 = vmatprep.subr.bf16.mxu1 (!%p239_p2), %v1270_v3  ;;  %1036 = vmatprep.mubr.msk.f32.mxu1 (!%p239_p2), %vm1271_vm0, %v1272_v6  ;;  %v1197_v7 = vpack.c.bf16 (!%p239_p2), %v298_v5, %v297_v2  ;;  %v1200_v11 = vpack.c.bf16 (!%p239_p2), %v503_v9, %v502_v8  ;;  %v504_v12 = vld [vmem:[%s1641_s3 + $0x10] sm:$0xff] (!%p239_p2)  ;;  %v505_v13 = vld [vmem:[%s1641_s3 + $0x18] sm:$0xff] (!%p239_p2)  ;;  %v506_v18 = vld [vmem:[%s1641_s3 + $0x20] sm:$0xff] (!%p239_p2) }
   0x8   : > { %1195 = vmatpush3.bf16.msra.mxu0 (!%p239_p2), %v1194_v4  ;;  %1249 = vmatpush3.bf16.msra.mxu1 (!%p239_p2), %v1194_v4  ;;  %v1203_v17 = vpack.c.bf16 (!%p239_p2), %v505_v13, %v504_v12  ;;  %v507_v19 = vld [vmem:[%s1641_s3 + $0x28] sm:$0xff] (!%p239_p2)  ;;  %v508_v23 = vld [vmem:[%s1641_s3 + $0x30] sm:$0xff] (!%p239_p2)  ;;  %v509_v24 = vld [vmem:[%s1641_s3 + $0x38] sm:$0xff] (!%p239_p2) }
   0x9   : > { %p271_p3 = scmp.lt.s32.totalorder (!%p239_p2), %s270_s11, 25  ;;  %1196 = vmatprep.subr.bf16.mxu0 (!%p239_p2), %v1270_v3  ;;  %1248 = vmatprep.subr.bf16.mxu1 (!%p239_p2), %v1270_v3  ;;  %v1206_v22 = vpack.c.bf16 (!%p239_p2), %v507_v19, %v506_v18  ;;  %v1209_v27 = vpack.c.bf16 (!%p239_p2), %v509_v24, %v508_v23  ;;  %v510_v28 = vld [vmem:[%s1641_s3 + $0x40] sm:$0xff] (!%p239_p2)  ;;  %v511_v29 = vld [vmem:[%s1641_s3 + $0x48] sm:$0xff] (!%p239_p2)  ;;  %v512_v33 = vld [vmem:[%s1641_s3 + $0x50] sm:$0xff] (!%p239_p2) }
   0xa   : > { %v1212_v32 = vpack.c.bf16 (!%p239_p2), %v511_v29, %v510_v28  ;;  %v513_v34 = vld [vmem:[%s1641_s3 + $0x58] sm:$0xff] (!%p239_p2)  ;;  %v514_v39 = vld [vmem:[%s1641_s3 + $0x60] sm:$0xff] (!%p239_p2)  ;;  %v515_v40 = vld [vmem:[%s1641_s3 + $0x68] sm:$0xff] (!%p239_p2) }
   0xb   : > { %v1215_v36 = vpack.c.bf16 (!%p239_p2), %v513_v34, %v512_v33  ;;  %v1218_v41 = vpack.c.bf16 (!%p239_p2), %v515_v40, %v514_v39  ;;  %v516_v42 = vld [vmem:[%s1641_s3 + $0x70] sm:$0xff] (!%p239_p2)  ;;  %v517_v43 = vld [vmem:[%s1641_s3 + $0x78] sm:$0xff] (!%p239_p2)  ;;  %v681_v45 = vld [vmem:[%s1643_s5] sm:$0xff] (!%p239_p2) }
   0xc   : > { %1198 = vmatpush3.bf16.msra.mxu0 (!%p239_p2), %v1197_v7  ;;  %1250 = vmatpush3.bf16.msra.mxu1 (!%p239_p2), %v1197_v7  ;;  %v1221_v44 = vpack.c.bf16 (!%p239_p2), %v517_v43, %v516_v42  ;;  %v682_v46 = vld [vmem:[%s1643_s5 + $0x8] sm:$0xff] (!%p239_p2)  ;;  %v683_v47 = vld [vmem:[%s1643_s5 + $0x10] sm:$0xff] (!%p239_p2)  ;;  %v684_v49 = vld [vmem:[%s1643_s5 + $0x18] sm:$0xff] (!%p239_p2) }
   0xd   : > { %s1647_s11 = smov (!%p271_p3, %s270_s11), 25  ;;  %1199 = vmatprep.subr.bf16.mxu1 %v1270_v3  ;;  %1223 = vmatprep.subr.bf16.mxu0 %v1270_v3  ;;  %v1224_v48 = vpack.c.bf16 %v682_v46, %v681_v45  ;;  %v1227_v50 = vpack.c.bf16 %v684_v49, %v683_v47  ;;  %v685_v51 = vld [vmem:[%s1643_s5 + $0x20] sm:$0xff]  ;;  %v686_v52 = vld [vmem:[%s1643_s5 + $0x28] sm:$0xff]  ;;  %v687_v54 = vld [vmem:[%s1643_s5 + $0x30] sm:$0xff] }
   0xe   : > { %s909_s16 = sshll.u32 %s1647_s11, 3  ;;  %v1230_v53 = vpack.c.bf16 %v686_v52, %v685_v51  ;;  %v688_v55 = vld [vmem:[%s1643_s5 + $0x38] sm:$0xff]  ;;  %v689_v57 = vld [vmem:[%s1643_s5 + $0x40] sm:$0xff]  ;;  %v690_v58 = vld [vmem:[%s1643_s5 + $0x48] sm:$0xff] }
   0xf   : > { %s1355_s19 = scalar_lea.vmem %s1638_s0, %s909_s16  ;;  %v1233_v56 = vpack.c.bf16 %v688_v55, %v687_v54  ;;  %v1236_v59 = vpack.c.bf16 %v690_v58, %v689_v57  ;;  %v691_v60 = vld [vmem:[%s1643_s5 + $0x50] sm:$0xff]  ;;  %v692_v61 = vld [vmem:[%s1643_s5 + $0x58] sm:$0xff]  ;;  %v693_v63 = vld [vmem:[%s1643_s5 + $0x60] sm:$0xff]  ;;  %s1607_s29 = scalar_lea.vmem %s1645_s7, %s909_s16 }
  0x10   : > { %v282_v10 = vld [vmem:[%s1355_s19] sm:$0xff]  ;;  %v283_v14 = vld [vmem:[%s1355_s19 + $0x8] sm:$0xff]  ;;  %v284_v20 = vld [vmem:[%s1355_s19 + $0x10] sm:$0xff]  ;;  %v1239_v62 = vpack.c.bf16 %v692_v61, %v691_v60 }
  0x11   : > { %1013 = vmatmul.mubr.msk.f32.vlgmr.msra.gmra.mrb[0].mxu0 %vm306_vm1, %v282_v10  ;;  %v290_v15 = vld [vmem:[%s1355_s19 + $0x40] sm:$0xff]  ;;  %v291_v16 = vld [vmem:[%s1355_s19 + $0x48] sm:$0xff]  ;;  %v292_v21 = vld [vmem:[%s1355_s19 + $0x50] sm:$0xff] }
  0x12   : > { %1015 = vmatprep.mubr.msk.f32.mxu0 %vm1271_vm0, %v1272_v6  ;;  %1037 = vmatmul.mubr.msk.f32.vlgmr.msra.gmra.mrb[0].mxu1 %vm306_vm1, %v290_v15  ;;  %v285_v25 = vld [vmem:[%s1355_s19 + $0x18] sm:$0xff]  ;;  %v286_v30 = vld [vmem:[%s1355_s19 + $0x20] sm:$0xff]  ;;  %v287_v35 = vld [vmem:[%s1355_s19 + $0x28] sm:$0xff] }
  0x13   : > { %1039 = vmatprep.mubr.msk.f32.mxu1 %vm1271_vm0, %v1272_v6  ;;  %1201 = vmatpush3.bf16.msra.mxu1 %v1200_v11  ;;  %v293_v26 = vld [vmem:[%s1355_s19 + $0x58] sm:$0xff]  ;;  %v294_v31 = vld [vmem:[%s1355_s19 + $0x60] sm:$0xff]  ;;  %v288_v37 = vld [vmem:[%s1355_s19 + $0x30] sm:$0xff] }
  0x14   : > { %1202 = vmatprep.subr.bf16.mxu1 %v1270_v3  ;;  %v289_v38 = vld [vmem:[%s1355_s19 + $0x38] sm:$0xff]  ;;  %1225 = vmatpush3.bf16.msra.mxu0 %v1224_v48  ;;  %v694_v0 = vld [vmem:[%s1643_s5 + $0x68] sm:$0xff]  ;;  %v1512_v2 = vld [vmem:[%s1640_s2] ss:$0 sm:$0xff] }
  0x15   : > { %1016 = vmatmul.mubr.msk.f32.gmra.mrb[2].mxu0 %vm306_vm1, %v283_v14  ;;  %1226 = vmatprep.subr.bf16.mxu0 %v1270_v3  ;;  %v1242_v1 = vpack.c.bf16 %v694_v0, %v693_v63 }
  0x16   : > { %1018 = vmatprep.mubr.msk.f32.mxu0 %vm1271_vm0, %v1272_v6  ;;  %1040 = vmatmul.mubr.msk.f32.gmra.mrb[2].mxu1 %vm306_vm1, %v291_v16 }
  0x17   : > { %1042 = vmatprep.mubr.msk.f32.mxu1 %vm1271_vm0, %v1272_v6  ;;  %1204 = vmatpush3.bf16.msra.mxu1 %v1203_v17 }
  0x18   : > { %1205 = vmatprep.subr.bf16.mxu1 %v1270_v3  ;;  %1228 = vmatpush3.bf16.msra.mxu0 %v1227_v50 }
  0x19   : > { %1019 = vmatmul.mubr.msk.f32.gmra.mrb[4].mxu0 %vm306_vm1, %v284_v20  ;;  %1229 = vmatprep.subr.bf16.mxu0 %v1270_v3 }
  0x1a   : > { %1021 = vmatprep.mubr.msk.f32.mxu0 %vm1271_vm0, %v1272_v6  ;;  %1043 = vmatmul.mubr.msk.f32.gmra.mrb[4].mxu1 %vm306_vm1, %v292_v21 }
  0x1b   : > { %1045 = vmatprep.mubr.msk.f32.mxu1 %vm1271_vm0, %v1272_v6  ;;  %1207 = vmatpush3.bf16.msra.mxu1 %v1206_v22 }
  0x1c   : > { %1208 = vmatprep.subr.bf16.mxu1 %v1270_v3  ;;  %1231 = vmatpush3.bf16.msra.mxu0 %v1230_v53 }
  0x1d   : > { %1022 = vmatmul.mubr.msk.f32.gmra.mrb[6].mxu0 %vm306_vm1, %v285_v25  ;;  %1232 = vmatprep.subr.bf16.mxu0 %v1270_v3 }
  0x1e   : > { %1024 = vmatprep.mubr.msk.f32.mxu0 %vm1271_vm0, %v1272_v6  ;;  %1046 = vmatmul.mubr.msk.f32.gmra.mrb[6].mxu1 %vm306_vm1, %v293_v26 }
  0x1f   : > { %1048 = vmatprep.mubr.msk.f32.mxu1 %vm1271_vm0, %v1272_v6  ;;  %1210 = vmatpush3.bf16.msra.mxu1 %v1209_v27 }
  0x20   : > { %1211 = vmatprep.subr.bf16.mxu1 %v1270_v3  ;;  %1234 = vmatpush3.bf16.msra.mxu0 %v1233_v56 }
  0x21   : > { %1025 = vmatmul.mubr.msk.f32.gmra.mrb[8].mxu0 %vm306_vm1, %v286_v30  ;;  %1235 = vmatprep.subr.bf16.mxu0 %v1270_v3 }
  0x22   : > { %1027 = vmatprep.mubr.msk.f32.mxu0 %vm1271_vm0, %v1272_v6  ;;  %1049 = vmatmul.mubr.msk.f32.gmra.mrb[8].mxu1 %vm306_vm1, %v294_v31 }
  0x23   : > { %1213 = vmatpush3.bf16.msra.mxu1 %v1212_v32  ;;  %1083 = vmatprep.mubr.msk.f32.mxu1 %vm1271_vm0, %v1272_v6 }
  0x24   : > { %1214 = vmatprep.subr.bf16.mxu1 %v1270_v3  ;;  %1237 = vmatpush3.bf16.msra.mxu0 %v1236_v59 }
  0x25   : > { %1028 = vmatmul.mubr.msk.f32.gmra.mrb[10].mxu0 %vm306_vm1, %v287_v35  ;;  %1238 = vmatprep.subr.bf16.mxu0 %v1270_v3 }
  0x26   : > { %1030 = vmatprep.mubr.msk.f32.mxu0 %vm1271_vm0, %v1272_v6 }
  0x27   : > { %1216 = vmatpush3.bf16.msra.mxu1 %v1215_v36 }
  0x28   : > { %1217 = vmatprep.subr.bf16.mxu1 %v1270_v3  ;;  %1240 = vmatpush3.bf16.msra.mxu0 %v1239_v62 }
  0x29   : > { %1031 = vmatmul.mubr.msk.f32.gmra.mrb[12].mxu0 %vm306_vm1, %v288_v37  ;;  %1241 = vmatprep.subr.bf16.mxu0 %v1270_v3 }
  0x2a   : > { %1033 = vmatprep.mubr.msk.f32.mxu0 %vm1271_vm0, %v1272_v6 }
  0x2b   : > { %1219 = vmatpush3.bf16.msra.mxu1 %v1218_v41 }
  0x2c   : > { %1220 = vmatprep.subr.bf16.mxu1 %v1270_v3  ;;  %1243 = vmatpush3.bf16.msra.mxu0 %v1242_v1 }
  0x2d   : > { %1034 = vmatmul.mubr.msk.f32.gmra.mrb[14].mxu0 %vm306_vm1, %v289_v38  ;;  %1244 = vmatprep.subr.bf16.mxu0 %v1270_v3 }
  0x2e   : > { %1154 = vmatprep.mubr.msk.f32.mxu0 %vm1271_vm0, %v1272_v6 }
  0x2f   : > { %1222 = vmatpush3.bf16.msra.mxu1 %v1221_v44 }
  0xe4   : > { %v412_v4 = vpop.f32.mrb[0].mxu0 }
  0xe5   : > { %v413_v5 = vadd.f32 %v1512_v2, %v412_v4  ;;  %v1014_v7 = vpop.f32.mrb[1].mxu0  ;;  %v452_v8 = vpop.f32.mrb[0].mxu1 }
  0xe6   : > { %v1038_v10 = vpop.f32.mrb[1].mxu1  ;;  %v453_v52 = vadd.f32 %v1512_v2, %v452_v8  ;;  %v695_v8 = vld [vmem:[%s1643_s5 + $0x70] sm:$0xff] }
  0xe7   : > { %v476_v9 = vmul.f32 0.01, %v413_v5  ;;  %v1560_v10 = vld [vmem:[%s1642_s4] ss:$0 sm:$0xff] }
  0xe8   : > { %v417_v11 = vpop.f32.mrb[2].mxu0  ;;  %v484_v55 = vmul.f32 0.01, %v453_v52 }
  0xe9   : > { %v489_v12 = vmax.f32 %v413_v5, %v476_v9  ;;  %v418_v13 = vadd.f32 %v1512_v2, %v417_v11  ;;  %v1017_v14 = vpop.f32.mrb[3].mxu0  ;;  %v457_v15 = vpop.f32.mrb[2].mxu1 }
  0xea   : > { %v1041_v3 = vpop.f32.mrb[3].mxu1  ;;  %v458_v56 = vadd.f32 %v1512_v2, %v457_v15  ;;  %v497_v57 = vmax.f32 %v453_v52, %v484_v55 }
  0xeb   : > { %v477_v16 = vmul.f32 0.01, %v418_v13  ;;  %1084 = vmatmul.mubr.f32.vlgmr.msra.gmra.mrb[10].mxu1 %v489_v12 }
  0xec   : > { %v422_v17 = vpop.f32.mrb[4].mxu0  ;;  %1086 = vmatprep.mubr.msk.f32.mxu1 %vm1271_vm0, %v1272_v6  ;;  %v485_v58 = vmul.f32 0.01, %v458_v56 }
  0xed   : > { %v490_v18 = vmax.f32 %v418_v13, %v477_v16  ;;  %v423_v19 = vadd.f32 %v1512_v2, %v422_v17  ;;  %v1020_v20 = vpop.f32.mrb[5].mxu0  ;;  %v462_v21 = vpop.f32.mrb[4].mxu1 }
  0xee   : > { %v1044_v23 = vpop.f32.mrb[5].mxu1  ;;  %v463_v59 = vadd.f32 %v1512_v2, %v462_v21  ;;  %v498_v60 = vmax.f32 %v458_v56, %v485_v58 }
  0xef   : > { %v478_v22 = vmul.f32 0.01, %v423_v19  ;;  %1087 = vmatmul.mubr.f32.gmra.mrb[12].mxu1 %v490_v18 }
  0xf0   : > { %v427_v24 = vpop.f32.mrb[6].mxu0  ;;  %1089 = vmatprep.mubr.msk.f32.mxu1 %vm1271_vm0, %v1272_v6  ;;  %v486_v61 = vmul.f32 0.01, %v463_v59 }
  0xf1   : > { %v491_v25 = vmax.f32 %v423_v19, %v478_v22  ;;  %v428_v26 = vadd.f32 %v1512_v2, %v427_v24  ;;  %v1023_v27 = vpop.f32.mrb[7].mxu0  ;;  %v467_v28 = vpop.f32.mrb[6].mxu1 }
  0xf2   : > { %v1047_v30 = vpop.f32.mrb[7].mxu1  ;;  %v468_v62 = vadd.f32 %v1512_v2, %v467_v28  ;;  %v499_v63 = vmax.f32 %v463_v59, %v486_v61 }
  0xf3   : > { %v479_v29 = vmul.f32 0.01, %v428_v26  ;;  %1090 = vmatmul.mubr.f32.gmra.mrb[14].mxu1 %v491_v25 }
  0xf4   : > { %v432_v31 = vpop.f32.mrb[8].mxu0  ;;  %1092 = vmatprep.mubr.msk.f32.mxu1 %vm1271_vm0, %v1272_v6  ;;  %v487_v0 = vmul.f32 0.01, %v468_v62 }
  0xf5   : > { %v492_v32 = vmax.f32 %v428_v26, %v479_v29  ;;  %v433_v33 = vadd.f32 %v1512_v2, %v432_v31  ;;  %v1026_v34 = vpop.f32.mrb[9].mxu0  ;;  %v472_v35 = vpop.f32.mrb[8].mxu1 }
  0xf6   : > { %v1050_v37 = vpop.f32.mrb[9].mxu1  ;;  %v473_v1 = vadd.f32 %v1512_v2, %v472_v35  ;;  %v500_v4 = vmax.f32 %v468_v62, %v487_v0 }
  0xf7   : > { %v480_v36 = vmul.f32 0.01, %v433_v33  ;;  %1093 = vmatmul.mubr.f32.gmra.mrb[16].mxu1 %v492_v32 }
  0xf8   : > { %v437_v38 = vpop.f32.mrb[10].mxu0  ;;  %1095 = vmatprep.mubr.msk.f32.mxu1 %vm1271_vm0, %v1272_v6  ;;  %v488_v5 = vmul.f32 0.01, %v473_v1 }
  0xf9   : > { %v493_v39 = vmax.f32 %v433_v33, %v480_v36  ;;  %v438_v40 = vadd.f32 %v1512_v2, %v437_v38  ;;  %v1029_v41 = vpop.f32.mrb[11].mxu0 }
  0xfa   : > { %v501_v7 = vmax.f32 %v473_v1, %v488_v5 }
  0xfb   : > { %v481_v42 = vmul.f32 0.01, %v438_v40  ;;  %1096 = vmatmul.mubr.f32.gmra.mrb[18].mxu1 %v493_v39 }
  0xfc   : > { %v442_v43 = vpop.f32.mrb[12].mxu0  ;;  %1098 = vmatprep.mubr.msk.f32.mxu1 %vm1271_vm0, %v1272_v6 }
  0xfd   : > { %v494_v44 = vmax.f32 %v438_v40, %v481_v42  ;;  %v443_v45 = vadd.f32 %v1512_v2, %v442_v43  ;;  %v1032_v46 = vpop.f32.mrb[13].mxu0 }
  0xff   : > { %v482_v47 = vmul.f32 0.01, %v443_v45  ;;  %1099 = vmatmul.mubr.f32.gmra.mrb[20].mxu1 %v494_v44 }
 0x100   : > { %v447_v48 = vpop.f32.mrb[14].mxu0  ;;  %1101 = vmatprep.mubr.msk.f32.mxu1 %vm1271_vm0, %v1272_v6 }
 0x101   : > { %v495_v49 = vmax.f32 %v443_v45, %v482_v47  ;;  %v448_v50 = vadd.f32 %v1512_v2, %v447_v48  ;;  %v1035_v51 = vpop.f32.mrb[15].mxu0  ;;  %v696_v2 = vld [vmem:[%s1643_s5 + $0x78] sm:$0xff] }
 0x102   : > { %v1245_v9 = vpack.c.bf16 %v696_v2, %v695_v8 }
 0x103   : > { %v483_v53 = vmul.f32 0.01, %v448_v50  ;;  %1102 = vmatmul.mubr.f32.gmra.mrb[22].mxu1 %v495_v49 }
 0x104   : > { %1104 = vmatprep.mubr.msk.f32.mxu1 %vm1271_vm0, %v1272_v6  ;;  %1246 = vmatpush3.bf16.msra.mxu0 %v1245_v9 }
 0x105   : > { %v496_v54 = vmax.f32 %v448_v50, %v483_v53 }
 0x107   : > { %1105 = vmatmul.mubr.f32.gmra.mrb[24].mxu1 %v496_v54 }
 0x108   : > { %1107 = vmatprep.mubr.msk.f32.mxu1 %vm1271_vm0, %v1272_v6 }
 0x10b   : > { %1108 = vmatmul.mubr.f32.gmra.mrb[26].mxu1 %v497_v57 }
 0x10c   : > { %1110 = vmatprep.mubr.msk.f32.mxu1 %vm1271_vm0, %v1272_v6 }
 0x10f   : > { %1111 = vmatmul.mubr.f32.gmra.mrb[28].mxu1 %v498_v60 }
 0x110   : > { %1113 = vmatprep.mubr.msk.f32.mxu1 %vm1271_vm0, %v1272_v6 }
 0x113   : > { %1114 = vmatmul.mubr.f32.gmra.mrb[30].mxu1 %v499_v63 }
 0x114   : > { %1116 = vmatprep.mubr.msk.f32.mxu1 %vm1271_vm0, %v1272_v6 }
 0x117   : > { %1117 = vmatmul.mubr.f32.gmra.mrb[32].mxu1 %v500_v4 }
 0x118   : > { %1119 = vmatprep.mubr.msk.f32.mxu1 %vm1271_vm0, %v1272_v6 }
 0x11b   : > { %1120 = vmatmul.mubr.f32.gmra.mrb[34].mxu1 %v501_v7 }
 0x1be   : > { %v591_v11 = vpop.f32.mrb[10].mxu1 }
 0x1bf   : > { %v592_v12 = vadd.f32 %v1560_v10, %v591_v11  ;;  %v1085_v13 = vpop.f32.mrb[11].mxu1 }
 0x1c1   : > { %v655_v14 = vmul.f32 0.01, %v592_v12 }
 0x1c2   : > { %v596_v15 = vpop.f32.mrb[12].mxu1 }
 0x1c3   : > { %v668_v16 = vmax.f32 %v592_v12, %v655_v14  ;;  %v597_v3 = vadd.f32 %v1560_v10, %v596_v15  ;;  %v1088_v17 = vpop.f32.mrb[13].mxu1  ;;  %v926_v14 = vld [vmem:[%s1644_s6] ss:$0 sm:$0xff] }
 0x1c5   : > { %v656_v18 = vmul.f32 0.01, %v597_v3  ;;  %1155 = vmatmul.mubr.f32.vlgmr.msra.gmra.mrb[16].mxu0 %v668_v16 }
 0x1c6   : > { %v601_v19 = vpop.f32.mrb[14].mxu1  ;;  %1157 = vmatprep.mubr.msk.f32.mxu0 %vm1271_vm0, %v1272_v6 }
 0x1c7   : > { %v669_v20 = vmax.f32 %v597_v3, %v656_v18  ;;  %v602_v21 = vadd.f32 %v1560_v10, %v601_v19  ;;  %v1091_v22 = vpop.f32.mrb[15].mxu1 }
 0x1c9   : > { %v657_v23 = vmul.f32 0.01, %v602_v21  ;;  %1158 = vmatmul.mubr.f32.gmra.mrb[18].mxu0 %v669_v20 }
 0x1ca   : > { %v606_v24 = vpop.f32.mrb[16].mxu1  ;;  %1160 = vmatprep.mubr.msk.f32.mxu0 %vm1271_vm0, %v1272_v6 }
 0x1cb   : > { %v670_v25 = vmax.f32 %v602_v21, %v657_v23  ;;  %v607_v26 = vadd.f32 %v1560_v10, %v606_v24  ;;  %v1094_v27 = vpop.f32.mrb[17].mxu1 }
 0x1cd   : > { %v658_v28 = vmul.f32 0.01, %v607_v26  ;;  %1161 = vmatmul.mubr.f32.gmra.mrb[20].mxu0 %v670_v25 }
 0x1ce   : > { %v611_v29 = vpop.f32.mrb[18].mxu1  ;;  %1163 = vmatprep.mubr.msk.f32.mxu0 %vm1271_vm0, %v1272_v6 }
 0x1cf   : > { %v671_v30 = vmax.f32 %v607_v26, %v658_v28  ;;  %v612_v31 = vadd.f32 %v1560_v10, %v611_v29  ;;  %v1097_v32 = vpop.f32.mrb[19].mxu1 }
 0x1d1   : > { %v659_v33 = vmul.f32 0.01, %v612_v31  ;;  %1164 = vmatmul.mubr.f32.gmra.mrb[22].mxu0 %v671_v30 }
 0x1d2   : > { %v616_v34 = vpop.f32.mrb[20].mxu1  ;;  %1166 = vmatprep.mubr.msk.f32.mxu0 %vm1271_vm0, %v1272_v6 }
 0x1d3   : > { %v672_v35 = vmax.f32 %v612_v31, %v659_v33  ;;  %v617_v36 = vadd.f32 %v1560_v10, %v616_v34  ;;  %v1100_v37 = vpop.f32.mrb[21].mxu1 }
 0x1d5   : > { %v660_v38 = vmul.f32 0.01, %v617_v36  ;;  %1167 = vmatmul.mubr.f32.gmra.mrb[24].mxu0 %v672_v35 }
 0x1d6   : > { %v621_v39 = vpop.f32.mrb[22].mxu1  ;;  %1169 = vmatprep.mubr.msk.f32.mxu0 %vm1271_vm0, %v1272_v6 }
 0x1d7   : > { %v673_v40 = vmax.f32 %v617_v36, %v660_v38  ;;  %v622_v41 = vadd.f32 %v1560_v10, %v621_v39  ;;  %v1103_v42 = vpop.f32.mrb[23].mxu1 }
 0x1d9   : > { %v661_v43 = vmul.f32 0.01, %v622_v41  ;;  %1170 = vmatmul.mubr.f32.gmra.mrb[26].mxu0 %v673_v40 }
 0x1da   : > { %v626_v44 = vpop.f32.mrb[24].mxu1  ;;  %1172 = vmatprep.mubr.msk.f32.mxu0 %vm1271_vm0, %v1272_v6 }
 0x1db   : > { %v674_v45 = vmax.f32 %v622_v41, %v661_v43  ;;  %v627_v46 = vadd.f32 %v1560_v10, %v626_v44  ;;  %v1106_v47 = vpop.f32.mrb[25].mxu1 }
 0x1dd   : > { %v662_v48 = vmul.f32 0.01, %v627_v46  ;;  %1173 = vmatmul.mubr.f32.gmra.mrb[28].mxu0 %v674_v45 }
 0x1de   : > { %v631_v49 = vpop.f32.mrb[26].mxu1  ;;  %1175 = vmatprep.mubr.msk.f32.mxu0 %vm1271_vm0, %v1272_v6 }
 0x1df   : > { %v675_v50 = vmax.f32 %v627_v46, %v662_v48  ;;  %v632_v51 = vadd.f32 %v1560_v10, %v631_v49  ;;  %v1109_v52 = vpop.f32.mrb[27].mxu1 }
 0x1e1   : > { %v663_v53 = vmul.f32 0.01, %v632_v51  ;;  %1176 = vmatmul.mubr.f32.gmra.mrb[30].mxu0 %v675_v50 }
 0x1e2   : > { %v636_v54 = vpop.f32.mrb[28].mxu1  ;;  %1178 = vmatprep.mubr.msk.f32.mxu0 %vm1271_vm0, %v1272_v6 }
 0x1e3   : > { %v676_v55 = vmax.f32 %v632_v51, %v663_v53  ;;  %v637_v56 = vadd.f32 %v1560_v10, %v636_v54  ;;  %v1112_v57 = vpop.f32.mrb[29].mxu1 }
 0x1e5   : > { %v664_v58 = vmul.f32 0.01, %v637_v56  ;;  %1179 = vmatmul.mubr.f32.gmra.mrb[32].mxu0 %v676_v55 }
 0x1e6   : > { %v641_v59 = vpop.f32.mrb[30].mxu1  ;;  %1181 = vmatprep.mubr.msk.f32.mxu0 %vm1271_vm0, %v1272_v6 }
 0x1e7   : > { %v677_v60 = vmax.f32 %v637_v56, %v664_v58  ;;  %v642_v61 = vadd.f32 %v1560_v10, %v641_v59  ;;  %v1115_v62 = vpop.f32.mrb[31].mxu1 }
 0x1e9   : > { %v665_v63 = vmul.f32 0.01, %v642_v61  ;;  %1182 = vmatmul.mubr.f32.gmra.mrb[34].mxu0 %v677_v60 }
 0x1ea   : > { %v646_v0 = vpop.f32.mrb[32].mxu1  ;;  %1184 = vmatprep.mubr.msk.f32.mxu0 %vm1271_vm0, %v1272_v6 }
 0x1eb   : > { %v678_v1 = vmax.f32 %v642_v61, %v665_v63  ;;  %v647_v4 = vadd.f32 %v1560_v10, %v646_v0  ;;  %v1118_v5 = vpop.f32.mrb[33].mxu1 }
 0x1ed   : > { %v666_v7 = vmul.f32 0.01, %v647_v4  ;;  %1185 = vmatmul.mubr.f32.gmra.mrb[36].mxu0 %v678_v1 }
 0x1ee   : > { %v651_v8 = vpop.f32.mrb[34].mxu1  ;;  %1187 = vmatprep.mubr.msk.f32.mxu0 %vm1271_vm0, %v1272_v6 }
 0x1ef   : > { %v679_v2 = vmax.f32 %v647_v4, %v666_v7  ;;  %v652_v9 = vadd.f32 %v1560_v10, %v651_v8  ;;  %v1121_v11 = vpop.f32.mrb[35].mxu1 }
 0x1f1   : > { %v667_v12 = vmul.f32 0.01, %v652_v9  ;;  %1188 = vmatmul.mubr.f32.gmra.mrb[38].mxu0 %v679_v2 }
 0x1f2   : > { %1190 = vmatprep.mubr.msk.f32.mxu0 %vm1271_vm0, %v1272_v6 }
 0x1f3   : > { %v680_v13 = vmax.f32 %v652_v9, %v667_v12 }
 0x1f5   : > { %1191 = vmatmul.mubr.f32.gmra.mrb[40].mxu0 %v680_v13 }
 0x298   : > { %v770_v10 = vpop.f32.mrb[16].mxu0 }
 0x299   : > { %v771_v15 = vadd.f32 %v926_v14, %v770_v10  ;;  %v1156_v6 = vpop.f32.mrb[17].mxu0 }
 0x29b   : > { %835 = vst.msk [vmem:[%s1607_s29] sm:$0xff] %vm834_vm2, %v771_v15 }
 0x29c   : > { %v775_v16 = vpop.f32.mrb[18].mxu0 }
 0x29d   : > { %v776_v3 = vadd.f32 %v926_v14, %v775_v16  ;;  %v1159_v17 = vpop.f32.mrb[19].mxu0 }
 0x29f   : > { %836 = vst.msk [vmem:[%s1607_s29 + $0x8] sm:$0xff] %vm834_vm2, %v776_v3 }
 0x2a0   : > { %v780_v18 = vpop.f32.mrb[20].mxu0 }
 0x2a1   : > { %v781_v19 = vadd.f32 %v926_v14, %v780_v18  ;;  %v1162_v20 = vpop.f32.mrb[21].mxu0 }
 0x2a3   : > { %837 = vst.msk [vmem:[%s1607_s29 + $0x10] sm:$0xff] %vm834_vm2, %v781_v19 }
 0x2a4   : > { %v785_v21 = vpop.f32.mrb[22].mxu0 }
 0x2a5   : > { %v786_v22 = vadd.f32 %v926_v14, %v785_v21  ;;  %v1165_v23 = vpop.f32.mrb[23].mxu0 }
 0x2a7   : > { %838 = vst.msk [vmem:[%s1607_s29 + $0x18] sm:$0xff] %vm834_vm2, %v786_v22 }
 0x2a8   : > { %v790_v24 = vpop.f32.mrb[24].mxu0 }
 0x2a9   : > { %v791_v25 = vadd.f32 %v926_v14, %v790_v24  ;;  %v1168_v26 = vpop.f32.mrb[25].mxu0 }
 0x2ab   : > { %839 = vst.msk [vmem:[%s1607_s29 + $0x20] sm:$0xff] %vm834_vm2, %v791_v25 }
 0x2ac   : > { %v795_v27 = vpop.f32.mrb[26].mxu0 }
 0x2ad   : > { %v796_v28 = vadd.f32 %v926_v14, %v795_v27  ;;  %v1171_v29 = vpop.f32.mrb[27].mxu0 }
 0x2af   : > { %840 = vst.msk [vmem:[%s1607_s29 + $0x28] sm:$0xff] %vm834_vm2, %v796_v28 }
 0x2b0   : > { %v800_v30 = vpop.f32.mrb[28].mxu0 }
 0x2b1   : > { %v801_v31 = vadd.f32 %v926_v14, %v800_v30  ;;  %v1174_v32 = vpop.f32.mrb[29].mxu0 }
 0x2b3   : > { %841 = vst.msk [vmem:[%s1607_s29 + $0x30] sm:$0xff] %vm834_vm2, %v801_v31 }
 0x2b4   : > { %v805_v33 = vpop.f32.mrb[30].mxu0 }
 0x2b5   : > { %v806_v34 = vadd.f32 %v926_v14, %v805_v33  ;;  %v1177_v35 = vpop.f32.mrb[31].mxu0 }
 0x2b7   : > { %842 = vst.msk [vmem:[%s1607_s29 + $0x38] sm:$0xff] %vm834_vm2, %v806_v34 }
 0x2b8   : > { %v810_v36 = vpop.f32.mrb[32].mxu0 }
 0x2b9   : > { %v811_v37 = vadd.f32 %v926_v14, %v810_v36  ;;  %v1180_v38 = vpop.f32.mrb[33].mxu0 }
 0x2bb   : > { %843 = vst.msk [vmem:[%s1607_s29 + $0x40] sm:$0xff] %vm834_vm2, %v811_v37 }
 0x2bc   : > { %v815_v39 = vpop.f32.mrb[34].mxu0 }
 0x2bd   : > { %v816_v40 = vadd.f32 %v926_v14, %v815_v39  ;;  %v1183_v41 = vpop.f32.mrb[35].mxu0 }
 0x2bf   : > { %844 = vst.msk [vmem:[%s1607_s29 + $0x48] sm:$0xff] %vm834_vm2, %v816_v40 }
 0x2c0   : > { %v820_v42 = vpop.f32.mrb[36].mxu0 }
 0x2c1   : > { %v821_v43 = vadd.f32 %v926_v14, %v820_v42  ;;  %v1186_v44 = vpop.f32.mrb[37].mxu0 }
 0x2c3   : > { %845 = vst.msk [vmem:[%s1607_s29 + $0x50] sm:$0xff] %vm834_vm2, %v821_v43 }
 0x2c4   : > { %v825_v45 = vpop.f32.mrb[38].mxu0 }
 0x2c5   : > { %v826_v46 = vadd.f32 %v926_v14, %v825_v45  ;;  %v1189_v47 = vpop.f32.mrb[39].mxu0 }
 0x2c7   : > { %846 = vst.msk [vmem:[%s1607_s29 + $0x58] sm:$0xff] %vm834_vm2, %v826_v46 }
 0x2c8   : > { %v830_v48 = vpop.f32.mrb[40].mxu0 }
 0x2c9   : > { %v831_v49 = vadd.f32 %v926_v14, %v830_v48  ;;  %v1192_v50 = vpop.f32.mrb[41].mxu0 }
 0x2cb   : > { %847 = vst.msk [vmem:[%s1607_s29 + $0x60] sm:$0xff] %vm834_vm2, %v831_v49 }
 0x2cc PF: > { %s17_s24 = sadd.s32 1, %s1268_s24  }
 0x2cd   : > { %p14_p4 = scmp.ge.s32.totalorder %s17_s24, 4  }
 0x2cf   :  { %16 = sbr.rel (!%p14_p4) target bundleno = 1 (0x1), region = 78 }

</bundles_post_ra>
